<compile_context>
chip_gen: v6e
topology: v6e:2x2x1
jax: 0.10.0
libtpu: 0.0.40
codegen_flags: <defaults>
</compile_context>

<pallas_src>
import functools
import math

import jax
import jax.numpy as jnp
from jax import lax
from jax.experimental import pallas as pl
from jax.experimental.pallas import tpu as pltpu

_MASK_VALUE = -1e30   # exp() underflows cleanly to 0; avoids inf-inf NaN in online softmax
_EPS_SQ = 1e-24       # F.normalize eps=1e-12, squared (used under rsqrt)


def _round_up(a: int, b: int) -> int:
    return -(-a // b) * b


def _contranorm_kernel(xq_ref, xk_ref, mask_ref, o_ref,
                       m_sc, l_sc, acc_sc, q_sc, *, scale, tau):
    j = pl.program_id(1)

    @pl.when(j == 0)
    def _init():
        m_sc[...] = jnp.full_like(m_sc, _MASK_VALUE)
        l_sc[...] = jnp.zeros_like(l_sc)
        acc_sc[...] = jnp.zeros_like(acc_sc)
        # Normalize the query rows once per row tile; fold 1/tau into the query
        # so the similarity matmul needs no post-scale.
        xq = xq_ref[...].astype(jnp.float32)
        inv_q = lax.rsqrt(jnp.maximum(jnp.sum(xq * xq, axis=1, keepdims=True), _EPS_SQ))
        q_sc[...] = (xq * (inv_q * (1.0 / tau))).astype(jnp.bfloat16)

    xk = xk_ref[...].astype(jnp.float32)                         # [tn, Dp] key rows (also V)
    inv_k = lax.rsqrt(jnp.maximum(jnp.sum(xk * xk, axis=1, keepdims=True), _EPS_SQ))
    k = (xk * inv_k).astype(jnp.bfloat16)                        # normalized keys, bf16
    v = xk.astype(jnp.bfloat16)                                  # raw values, bf16

    # Similarity tile: (q/tau) @ k^T as an NT contraction straight to the MXU,
    # bf16 operands with f32 accumulation.
    s = lax.dot_general(
        q_sc[...], k,
        dimension_numbers=(((1,), (1,)), ((), ())),
        preferred_element_type=jnp.float32,
    )                                                            # [tm, tn]

    # Mask listed edges and padded key columns.
    masked = mask_ref[...] != 0
    s = jnp.where(masked, _MASK_VALUE, s)

    # Online softmax update (all softmax math in f32).
    m_prev = m_sc[...]
    m_new = jnp.maximum(m_prev, jnp.max(s, axis=1, keepdims=True))
    alpha = jnp.exp(m_prev - m_new)
    p = jnp.exp(s - m_new)
    # Explicitly zero masked columns: when every column of this tile is masked,
    # m_new == _MASK_VALUE and exp(s - m_new) == 1 there, which must not count.
    p = jnp.where(masked, 0.0, p)
    l_sc[...] = alpha * l_sc[...] + jnp.sum(p, axis=1, keepdims=True)
    acc_sc[...] = alpha * acc_sc[...] + jnp.dot(
        p.astype(jnp.bfloat16), v, preferred_element_type=jnp.float32)
    m_sc[...] = m_new

    @pl.when(j == pl.num_programs(1) - 1)
    def _finalize():
        x_neg = acc_sc[...] * pl.reciprocal(l_sc[...], approx=True)
        xq = xq_ref[...].astype(jnp.float32)
        o_ref[...] = ((1.0 + scale) * xq - scale * x_neg).astype(o_ref.dtype)


def contranorm(x, edge_index, scale, tau, *, block_q=256, block_k=512):
    """ContraNorm forward. scale/tau are static (baked at trace time)."""
    assert block_q % 32 == 0 and block_k % 128 == 0
    N, D = x.shape
    Dp = _round_up(D, 128)                    # lane-dense feature / output dim
    tm = min(block_q, _round_up(N, 32))       # row (query) tile; 32-aligned for the int8 mask
    tn = min(block_k, _round_up(N, 128))      # key/column tile (softmax lane axis)
    Np = _round_up(N, math.lcm(tm, tn))       # rows must tile by both tm and tn

    # Zero-pad rows and features (padded key columns get masked below).
    x_pad = jnp.zeros((Np, Dp), x.dtype).at[:N, :D].set(x)

    # Dense edge mask as int8 (4x smaller than int32).
    # TODO(synk): for very large N, build the mask in-kernel from a scalar-prefetched,
    # row-bucketed edge list instead of streaming an N^2 byte mask from HBM.
    mask = jnp.zeros((Np, Np), jnp.int8)
    mask = mask.at[edge_index[0], edge_index[1]].set(1)
    if Np > N:
        mask = mask.at[:, N:].set(1)          # mask out padded key columns

    kernel = functools.partial(_contranorm_kernel, scale=float(scale), tau=float(tau))
    grid = (Np // tm, Np // tn)

    out = pl.pallas_call(
        kernel,
        out_shape=jax.ShapeDtypeStruct((Np, Dp), x.dtype),
        grid_spec=pltpu.PrefetchScalarGridSpec(
            num_scalar_prefetch=0,
            grid=grid,
            in_specs=[
                pl.BlockSpec((tm, Dp), lambda i, j: (i, 0)),    # x row tile (queries / blend)
                pl.BlockSpec((tn, Dp), lambda i, j: (j, 0)),    # x key tile (K and V)
                pl.BlockSpec((tm, tn), lambda i, j: (i, j)),    # int8 edge-mask tile
            ],
            out_specs=pl.BlockSpec((tm, Dp), lambda i, j: (i, 0)),
            scratch_shapes=[
                pltpu.VMEM((tm, 1), jnp.float32),     # running row max m
                pltpu.VMEM((tm, 1), jnp.float32),     # running denominator l
                pltpu.VMEM((tm, Dp), jnp.float32),    # running numerator acc
                pltpu.VMEM((tm, Dp), jnp.bfloat16),   # cached normalized query / tau
            ],
        ),
        compiler_params=pltpu.CompilerParams(
            dimension_semantics=("parallel", "arbitrary"),
            vmem_limit_bytes=64 * 1024 * 1024,
        ),
    )(x_pad, x_pad, mask)

    return out[:N, :D]


def contranorm_ref(x, edge_index, scale, tau):
    """Pure-JAX reference mirroring the PyTorch forward."""
    norm_x = x / jnp.maximum(jnp.sqrt(jnp.sum(x * x, axis=1, keepdims=True)), 1e-12)
    sim = norm_x @ norm_x.T / tau
    sim = sim.at[edge_index[0], edge_index[1]].set(-jnp.inf)
    sim = jax.nn.softmax(sim, axis=1)
    x_neg = sim @ x
    return (1.0 + scale) * x - scale * x_neg


def _make_inputs(key, N, D, E):
    kx, k0, k1 = jax.random.split(key, 3)
    x = jax.random.normal(kx, (N, D), jnp.float32)
    edge_index = jnp.stack(
        [jax.random.randint(k0, (E,), 0, N),
         jax.random.randint(k1, (E,), 0, N)],
        axis=0,
    )
    return x, edge_index


if __name__ == "__main__":
    scale, tau = 0.1, 1.0
    key = jax.random.PRNGKey(0)
    k1, k2 = jax.random.split(key)

    # Case 1: small graph, exercises row/feature padding (single key tile).
    x1, e1 = _make_inputs(k1, 16, 32, 20)
    out1 = jax.block_until_ready(contranorm(x1, e1, scale, tau))
    ref1 = contranorm_ref(x1, e1, scale, tau)
    assert out1.shape == x1.shape
    assert jnp.allclose(out1, ref1, atol=2e-2, rtol=2e-2), "mismatch vs reference (case 1)"

    # Case 2: multiple row tiles AND key tiles -> validates online softmax across tiles.
    x2, e2 = _make_inputs(k2, 200, 48, 400)
    out2 = jax.block_until_ready(
        contranorm(x2, e2, scale, tau, block_q=64, block_k=128)
    )
    ref2 = contranorm_ref(x2, e2, scale, tau)
    assert out2.shape == x2.shape
    assert jnp.allclose(out2, ref2, atol=2e-2, rtol=2e-2), "mismatch vs reference (case 2)"

    print("KERNEL_OK")
</pallas_src>

<mosaic_0001>
module attributes {stable_mosaic.version = 11 : i64} {
  func.func @_contranorm_kernel(%arg0: i32, %arg1: i32, %arg2: memref<32x128xf32, #tpu.memory_space<vmem>>, %arg3: memref<128x128xf32, #tpu.memory_space<vmem>>, %arg4: memref<32x128xi8, #tpu.memory_space<vmem>>, %arg5: memref<32x128xf32, #tpu.memory_space<vmem>>, %arg6: memref<32x1xf32, #tpu.memory_space<vmem>>, %arg7: memref<32x1xf32, #tpu.memory_space<vmem>>, %arg8: memref<32x128xf32, #tpu.memory_space<vmem>>, %arg9: memref<32x128xbf16, #tpu.memory_space<vmem>>) attributes {dimension_semantics = [#tpu.dimension_semantics<parallel>, #tpu.dimension_semantics<arbitrary>], iteration_bounds = array<i64: 4, 1>, scalar_prefetch = 0 : i64, scratch_operands = 4 : i64, tpu.core_type = #tpu.core_type<tc>, window_params = [{transform_indices = @transform_0, window_bounds = array<i64: 32, 128>}, {transform_indices = @transform_1, window_bounds = array<i64: 128, 128>}, {transform_indices = @transform_2, window_bounds = array<i64: 32, 128>}, {transform_indices = @transform_3, window_bounds = array<i64: 32, 128>}]} {
    %c0_i32 = arith.constant 0 : i32
    %0 = arith.cmpi eq, %arg1, %c0_i32 : i32
    %1 = arith.extui %0 : i1 to i32
    %c0_i32_0 = arith.constant 0 : i32
    %2 = arith.cmpi ne, %1, %c0_i32_0 : i32
    scf.if %2 {
      %cst_27 = arith.constant -1.000000e+30 : f32
      %49 = vector.broadcast %cst_27 : f32 to vector<32x1xf32>
      %c0_28 = arith.constant 0 : index
      %c0_29 = arith.constant 0 : index
      %50 = vector.load %arg6[%c0_28, %c0_29] : memref<32x1xf32, #tpu.memory_space<vmem>>, vector<32x1xf32>
      tpu.vector_store %arg6[%c0_28, %c0_29], %49 {strides = array<i32>} : memref<32x1xf32, #tpu.memory_space<vmem>>, vector<32x1xf32>,
      %cst_30 = arith.constant 0.000000e+00 : f32
      %51 = vector.broadcast %cst_30 : f32 to vector<32x1xf32>
      %c0_31 = arith.constant 0 : index
      %c0_32 = arith.constant 0 : index
      %52 = vector.load %arg7[%c0_31, %c0_32] : memref<32x1xf32, #tpu.memory_space<vmem>>, vector<32x1xf32>
      tpu.vector_store %arg7[%c0_31, %c0_32], %51 {strides = array<i32>} : memref<32x1xf32, #tpu.memory_space<vmem>>, vector<32x1xf32>,
      %cst_33 = arith.constant 0.000000e+00 : f32
      %53 = vector.broadcast %cst_33 : f32 to vector<32x128xf32>
      %c0_34 = arith.constant 0 : index
      %c0_35 = arith.constant 0 : index
      %54 = vector.load %arg8[%c0_34, %c0_35] : memref<32x128xf32, #tpu.memory_space<vmem>>, vector<32x128xf32>
      tpu.vector_store %arg8[%c0_34, %c0_35], %53 {strides = array<i32>} : memref<32x128xf32, #tpu.memory_space<vmem>>, vector<32x128xf32>,
      %c0_36 = arith.constant 0 : index
      %c0_37 = arith.constant 0 : index
      %55 = vector.load %arg2[%c0_36, %c0_37] : memref<32x128xf32, #tpu.memory_space<vmem>>, vector<32x128xf32>
      %56 = arith.mulf %55, %55 : vector<32x128xf32>
      %cst_38 = arith.constant dense<0.000000e+00> : vector<32xf32>
      %57 = vector.multi_reduction <add>, %56, %cst_38 [1] : vector<32x128xf32> to vector<32xf32>
      %58 = vector.shape_cast %57 : vector<32xf32> to vector<32x1xf32>
      %cst_39 = arith.constant 1.000000e-24 : f32
      %59 = vector.broadcast %cst_39 : f32 to vector<32x1xf32>
      %60 = arith.maximumf %58, %59 : vector<32x1xf32>
      %61 = math.rsqrt %60 : vector<32x1xf32>
      %cst_40 = arith.constant 1.000000e+00 : f32
      %62 = vector.broadcast %cst_40 : f32 to vector<32x1xf32>
      %63 = arith.mulf %61, %62 : vector<32x1xf32>
      %64 = vector.broadcast %63 : vector<32x1xf32> to vector<32x128xf32>
      %65 = arith.mulf %55, %64 : vector<32x128xf32>
      %66 = arith.truncf %65 : vector<32x128xf32> to vector<32x128xbf16>
      %c0_41 = arith.constant 0 : index
      %c0_42 = arith.constant 0 : index
      %67 = vector.load %arg9[%c0_41, %c0_42] : memref<32x128xbf16, #tpu.memory_space<vmem>>, vector<32x128xbf16>
      tpu.vector_store %arg9[%c0_41, %c0_42], %66 {strides = array<i32>} : memref<32x128xbf16, #tpu.memory_space<vmem>>, vector<32x128xbf16>,
    } else {
    }
    %c0 = arith.constant 0 : index
    %c0_1 = arith.constant 0 : index
    %3 = vector.load %arg3[%c0, %c0_1] : memref<128x128xf32, #tpu.memory_space<vmem>>, vector<128x128xf32>
    %4 = arith.mulf %3, %3 : vector<128x128xf32>
    %cst = arith.constant dense<0.000000e+00> : vector<128xf32>
    %5 = vector.multi_reduction <add>, %4, %cst [1] : vector<128x128xf32> to vector<128xf32>
    %6 = vector.shape_cast %5 : vector<128xf32> to vector<128x1xf32>
    %cst_2 = arith.constant 1.000000e-24 : f32
    %7 = vector.broadcast %cst_2 : f32 to vector<128x1xf32>
    %8 = arith.maximumf %6, %7 : vector<128x1xf32>
    %9 = math.rsqrt %8 : vector<128x1xf32>
    %10 = vector.broadcast %9 : vector<128x1xf32> to vector<128x128xf32>
    %11 = arith.mulf %3, %10 : vector<128x128xf32>
    %12 = arith.truncf %11 : vector<128x128xf32> to vector<128x128xbf16>
    %13 = arith.truncf %3 : vector<128x128xf32> to vector<128x128xbf16>
    %c0_3 = arith.constant 0 : index
    %c0_4 = arith.constant 0 : index
    %14 = vector.load %arg9[%c0_3, %c0_4] : memref<32x128xbf16, #tpu.memory_space<vmem>>, vector<32x128xbf16>
    %cst_5 = arith.constant dense<0.000000e+00> : vector<32x128xf32>
    %15 = tpu.matmul %14, %12, %cst_5 {dimension_numbers = #tpu.dot_dimension_numbers<[1], [1], [0], [0], [0, 0, 1, 0], [], []>} : vector<32x128xbf16>, vector<128x128xbf16>, vector<32x128xf32> -> vector<32x128xf32>
    %c0_6 = arith.constant 0 : index
    %c0_7 = arith.constant 0 : index
    %16 = vector.load %arg4[%c0_6, %c0_7] : memref<32x128xi8, #tpu.memory_space<vmem>>, vector<32x128xi8>
    %c0_i8 = arith.constant 0 : i8
    %17 = vector.broadcast %c0_i8 : i8 to vector<32x128xi8>
    %18 = arith.cmpi ne, %16, %17 : vector<32x128xi8>
    %cst_8 = arith.constant -1.000000e+30 : f32
    %19 = vector.broadcast %cst_8 : f32 to vector<32x128xf32>
    %20 = arith.select %18, %19, %15 : vector<32x128xi1>, vector<32x128xf32>
    %c0_9 = arith.constant 0 : index
    %c0_10 = arith.constant 0 : index
    %21 = vector.load %arg6[%c0_9, %c0_10] : memref<32x1xf32, #tpu.memory_space<vmem>>, vector<32x1xf32>
    %cst_11 = arith.constant dense<0xFF800000> : vector<32xf32>
    %22 = vector.multi_reduction <maximumf>, %20, %cst_11 [1] : vector<32x128xf32> to vector<32xf32>
    %23 = vector.shape_cast %22 : vector<32xf32> to vector<32x1xf32>
    %24 = arith.maximumf %21, %23 : vector<32x1xf32>
    %25 = arith.subf %21, %24 : vector<32x1xf32>
    %26 = math.exp %25 : vector<32x1xf32>
    %27 = vector.broadcast %24 : vector<32x1xf32> to vector<32x128xf32>
    %28 = arith.subf %20, %27 : vector<32x128xf32>
    %29 = math.exp %28 : vector<32x128xf32>
    %cst_12 = arith.constant 0.000000e+00 : f32
    %30 = vector.broadcast %cst_12 : f32 to vector<32x128xf32>
    %31 = arith.select %18, %30, %29 : vector<32x128xi1>, vector<32x128xf32>
    %c0_13 = arith.constant 0 : index
    %c0_14 = arith.constant 0 : index
    %32 = vector.load %arg7[%c0_13, %c0_14] : memref<32x1xf32, #tpu.memory_space<vmem>>, vector<32x1xf32>
    %33 = arith.mulf %26, %32 : vector<32x1xf32>
    %cst_15 = arith.constant dense<0.000000e+00> : vector<32xf32>
    %34 = vector.multi_reduction <add>, %31, %cst_15 [1] : vector<32x128xf32> to vector<32xf32>
    %35 = vector.shape_cast %34 : vector<32xf32> to vector<32x1xf32>
    %36 = arith.addf %33, %35 : vector<32x1xf32>
    %c0_16 = arith.constant 0 : index
    %c0_17 = arith.constant 0 : index
    %37 = vector.load %arg7[%c0_16, %c0_17] : memref<32x1xf32, #tpu.memory_space<vmem>>, vector<32x1xf32>
    tpu.vector_store %arg7[%c0_16, %c0_17], %36 {strides = array<i32>} : memref<32x1xf32, #tpu.memory_space<vmem>>, vector<32x1xf32>,
    %c0_18 = arith.constant 0 : index
    %c0_19 = arith.constant 0 : index
    %38 = vector.load %arg8[%c0_18, %c0_19] : memref<32x128xf32, #tpu.memory_space<vmem>>, vector<32x128xf32>
    %39 = vector.broadcast %26 : vector<32x1xf32> to vector<32x128xf32>
    %40 = arith.mulf %39, %38 : vector<32x128xf32>
    %41 = arith.truncf %31 : vector<32x128xf32> to vector<32x128xbf16>
    %cst_20 = arith.constant dense<0.000000e+00> : vector<32x128xf32>
    %42 = tpu.matmul %41, %13, %cst_20 {dimension_numbers = #tpu.dot_dimension_numbers<[1], [0], [0], [1], [0, 0, 1, 1], [], []>} : vector<32x128xbf16>, vector<128x128xbf16>, vector<32x128xf32> -> vector<32x128xf32>
    %43 = arith.addf %40, %42 : vector<32x128xf32>
    %c0_21 = arith.constant 0 : index
    %c0_22 = arith.constant 0 : index
    %44 = vector.load %arg8[%c0_21, %c0_22] : memref<32x128xf32, #tpu.memory_space<vmem>>, vector<32x128xf32>
    tpu.vector_store %arg8[%c0_21, %c0_22], %43 {strides = array<i32>} : memref<32x128xf32, #tpu.memory_space<vmem>>, vector<32x128xf32>,
    %c0_23 = arith.constant 0 : index
    %c0_24 = arith.constant 0 : index
    %45 = vector.load %arg6[%c0_23, %c0_24] : memref<32x1xf32, #tpu.memory_space<vmem>>, vector<32x1xf32>
    tpu.vector_store %arg6[%c0_23, %c0_24], %24 {strides = array<i32>} : memref<32x1xf32, #tpu.memory_space<vmem>>, vector<32x1xf32>,
    %c0_i32_25 = arith.constant 0 : i32
    %46 = arith.cmpi eq, %arg1, %c0_i32_25 : i32
    %47 = arith.extui %46 : i1 to i32
    %c0_i32_26 = arith.constant 0 : i32
    %48 = arith.cmpi ne, %47, %c0_i32_26 : i32
    scf.if %48 {
      %c0_27 = arith.constant 0 : index
      %c0_28 = arith.constant 0 : index
      %49 = vector.load %arg8[%c0_27, %c0_28] : memref<32x128xf32, #tpu.memory_space<vmem>>, vector<32x128xf32>
      %c0_29 = arith.constant 0 : index
      %c0_30 = arith.constant 0 : index
      %50 = vector.load %arg7[%c0_29, %c0_30] : memref<32x1xf32, #tpu.memory_space<vmem>>, vector<32x1xf32>
      %51 = tpu.reciprocal %50 {approx = true} : vector<32x1xf32> -> vector<32x1xf32>
      %52 = vector.broadcast %51 : vector<32x1xf32> to vector<32x128xf32>
      %53 = arith.mulf %49, %52 : vector<32x128xf32>
      %c0_31 = arith.constant 0 : index
      %c0_32 = arith.constant 0 : index
      %54 = vector.load %arg2[%c0_31, %c0_32] : memref<32x128xf32, #tpu.memory_space<vmem>>, vector<32x128xf32>
      %cst_33 = arith.constant 1.100000e+00 : f32
      %55 = vector.broadcast %cst_33 : f32 to vector<32x128xf32>
      %56 = arith.mulf %55, %54 : vector<32x128xf32>
      %cst_34 = arith.constant 1.000000e-01 : f32
      %57 = vector.broadcast %cst_34 : f32 to vector<32x128xf32>
      %58 = arith.mulf %57, %53 : vector<32x128xf32>
      %59 = arith.subf %56, %58 : vector<32x128xf32>
      %c0_35 = arith.constant 0 : index
      %c0_36 = arith.constant 0 : index
      %60 = vector.load %arg5[%c0_35, %c0_36] : memref<32x128xf32, #tpu.memory_space<vmem>>, vector<32x128xf32>
      tpu.vector_store %arg5[%c0_35, %c0_36], %59 {strides = array<i32>} : memref<32x128xf32, #tpu.memory_space<vmem>>, vector<32x128xf32>,
    } else {
    }
    return
  }
  func.func @transform_0(%arg0: i32, %arg1: i32) -> (i32, i32) {
    %c0_i32 = arith.constant 0 : i32
    %c0_i32_0 = arith.constant 0 : i32
    return %arg0, %c0_i32 : i32, i32
  }
  func.func @transform_1(%arg0: i32, %arg1: i32) -> (i32, i32) {
    %c0_i32 = arith.constant 0 : i32
    %c0_i32_0 = arith.constant 0 : i32
    return %arg1, %c0_i32 : i32, i32
  }
  func.func @transform_2(%arg0: i32, %arg1: i32) -> (i32, i32) {
    %c0_i32 = arith.constant 0 : i32
    return %arg0, %arg1 : i32, i32
  }
  func.func @transform_3(%arg0: i32, %arg1: i32) -> (i32, i32) {
    %c0_i32 = arith.constant 0 : i32
    %c0_i32_0 = arith.constant 0 : i32
    return %arg0, %c0_i32 : i32, i32
  }
}

</mosaic_0001>

<bundles_post_ra>
// kernel: tpu_custom_call.1
= control target key start
LH: loop header
LB: loop body
LE: loop exit
PB: predicated region body
PF: predicated region fallthrough
CT: control target
= control target key end

     0   :  { %8 = vsyncpa [#allocation7], 0  ;;  %s1849_s0 = inlined_call_operand.hbm [shape: f32[128,128], index: 0, kind: input, shape index: {}]   ;;  %s1850_s1 = inlined_call_operand.hbm [shape: f32[128,128], index: 1, kind: input, shape index: {}]   ;;  %s1851_s2 = inlined_call_operand.hbm [shape: s8[128,128], index: 2, kind: input, shape index: {}]   ;;  %s1852_s3 = inlined_call_operand.hbm [shape: f32[128,128], index: 3, kind: output, shape index: {}]  }
   0x1   :  { %10 = vsyncpa [#allocation7 + $0x1], 0 }
   0x2   :  { %11 = vsyncpa [#allocation10], 0 }
   0x3   :  { %12 = vsyncpa [#allocation8], 0 }
   0x4   :  { %14 = vsyncpa [#allocation8 + $0x1], 0  ;;  %s1396_s12 = smov 0   ;;  %s1398_s13 = smov 0  }
   0x5   :  { %s1400_s14 = smov 0   ;;  %s1402_s15 = smov 0  }
   0x6   :  { %s1404_s16 = smov 0   ;;  %s1406_s17 = smov 0  }
   0x7 LB: > { %s32_s18 = sadd.s32 1, %s1359_s16  ;;  %s39_s19 = sadd.s32 1, %s1351_s14  ;;  %s1363_s17 = sphi %s1406_s17, %s20_s17   ;;  %s1359_s16 = sphi %s1404_s16, %s1883_s16   ;;  %s1355_s15 = sphi %s1402_s15, %s1882_s15   ;;  %s1351_s14 = sphi %s1400_s14, %s1881_s14   ;;  %s1347_s13 = sphi %s1398_s13, %s1880_s13   ;;  %s1343_s12 = sphi %s1396_s12, %s1879_s12  }
   0x8   : > { %p34_p0 = scmp.ge.s32.totalorder %s32_s18, 4  ;;  %p46_p1 = scmp.ne.s32.totalorder %s1351_s14, %s1347_s13 }
   0x9   : > { %p47_p2 = scmp.eq.s32.totalorder %s1363_s17, 0  ;;  %p1066_p5 = scmp.lt.s32.totalorder %s1363_s17, 4 }
   0xa   : > { %s1885_s18 = smov (%p34_p0, %s32_s18), 0  ;;  %s172_s22 = sand.u32 1, %s1363_s17  }
   0xb   : > { %p1436_p3 = por %p47_p2, %p46_p1  ;;  %s36_s21 = ssub.s32 %s1359_s16, %s1885_s18 }
   0xc   : > { %p37_p4 = scmp.eq.s32.totalorder %s36_s21, 0  ;;  %s174_s23 = sand.u32 1, %s1351_s14  }
   0xd   : > { %s932_s25 = sshll.u32 %s174_s23, 5  ;;  %s963_s26 = sshll.u32 %s1359_s16, 9 }
   0xe   : > { %s1446_s24 = scalar_select %p37_p4, %s1351_s14, %s39_s19  }
   0xf   : > { %s182_s29 = scalar_lea.hbm %s1849_s0, %s963_s26  ;;  %s176_s30 = scalar_lea.vmem [#allocation6], %s932_s25 }
  0x10   : > { %s183_s4 = sshll.u32 %s176_s30, 4  ;;  %p1456_p6 = pnand %p1066_p5, %p1436_p3  ;;  %s184_s4 = int_to_ptr.vmem [resolvable:$true] %s183_s4 }
  0x11   : > { %s1460_s6 = scalar_lea.sflag [#allocation7], %s172_s22  ;;  %s1206_s7 = scalar_lea.vmem %s184_s4, 512 }
  0x12   : > { %p1854_p7 = pneg %p1456_p6  ;;  %p1207_p8 = scmp.ne.s32.totalorder %s184_s4, %s1206_s7 }
  0x13   : > { %s1365_s8 = smov [#allocation6]  }
  0x14   : > { %p1209_p9 = pnand %p1207_p8, %p1854_p7  ;;  %s1211_s9 = sshll.u32 %s1365_s8, 4  ;;  %s1212_s9 = int_to_ptr.vmem [resolvable:$false] %s1211_s9 }
  0x15   : > { %s1213_s10 = scalar_lea.vmem %s1212_s9, 1024  ;;  %p1214_p11 = scmp.lt.s32.totalorder %s184_s4, %s1212_s9 }
  0x16   : > { %p1210_p10 = pneg %p1209_p9  ;;  %p1215_p12 = scmp.lt.s32.totalorder %s1213_s10, %s1206_s7 }
  0x18   : > { %p1216_p13 = por %p1215_p12, %p1214_p11 }
  0x1a   : > { %p1217_p0 = pnand %p1216_p13, %p1210_p10 }
  0x1c   : > { %1220 = shalt.err (!%p1217_p0)
}
  0x1d   : > { %s1853_s11 = smov 128   ;;  %s1367_s19 = smov 8  }
  0x1e   : > { %1057 = dma.hbm_to_vmem [thread:$0]  (!%p1456_p6), %s182_s29, 512, %s184_s4, %s1460_s6, %s1853_s11, %s1853_s11, %s1367_s19  }
  0x1f   : > { %s1474_s20 = sadd.s32 4294967295, %s1363_s17   ;;  %s928_s21 = sadd.s32 4294967294, %s1363_s17  }
  0x20   : > { %p52_p2 = scmp.ne.s32.totalorder %s1347_s13, %s1343_s12  ;;  %p1856_p3 = scmp.eq.s32.totalorder %s1474_s20, 0 }
  0x21   : > { %p130_p4 = scmp.eq.s32.totalorder %s1474_s20, 3  ;;  %p136_p5 = scmp.eq.s32.totalorder %s928_s21, 3 }
  0x22   : > { %p929_p8 = scmp.ge.s32.totalorder %s1363_s17, 1  ;;  %p1484_p9 = por %p1856_p3, %p52_p2 }
  0x23   : > { %p1491_p10 = por %p130_p4, %p46_p1  ;;  %p1495_p11 = por %p136_p5, %p52_p2 }
  0x24   : > { %s1860_s22 = scalar_select %p1484_p9, 1, 0 }
  0x25   : > { %s1861_s25 = scalar_select %p1491_p10, 1, 0 }
  0x26   : > { %s1862_s26 = scalar_select %p1495_p11, 1, 0 }
  0x27   : > { %p143_p12 = scmp.lt.s32.totalorder %s1363_s17, 5  ;;  %s1368_s28 = smov [#allocation9]  }
  0x28   : > { %s158_s29 = sshll.u32 %s1368_s28, 4  ;;  %s935_s30 = sshll.u32 %s174_s23, 3  ;;  %s159_s29 = int_to_ptr.vmem [resolvable:$true] %s158_s29 }
  0x29   : > { %p1500_p13 = pnand %p929_p8, %p143_p12  ;;  %s936_s4 = sshll.u32 %s1359_s16, 7 }
  0x2a   : > { %s197_s7 = scalar_lea.vmem [#allocation11], %s935_s30  ;;  %s203_s21 = scalar_lea.hbm %s1851_s2, %s936_s4 }
  0x2b   : > { %p1050_p0 = pneg %p1500_p13  ;;  %s205_s8 = sshll.u32 %s197_s7, 4  ;;  %s206_s8 = int_to_ptr.vmem [resolvable:$true] %s205_s8 }
  0x2c   : > { %s1232_s11 = scalar_lea.vmem %s159_s29, 2048  ;;  %p1240_p12 = scmp.lt.s32.totalorder %s159_s29, %s159_s29 }
  0x2d   : > { %p1051_p1 = pnand %p1050_p0, %p1856_p3  ;;  %p1233_p4 = scmp.ne.s32.totalorder %s159_s29, %s1232_s11 }
  0x2e   : > { %p1241_p7 = scmp.lt.s32.totalorder %s1232_s11, %s1232_s11 }
  0x2f   : > { %p1223_p2 = pneg %p1051_p1 }
  0x30   : > { %p1242_p11 = por %p1241_p7, %p1240_p12 }
  0x31   : > { %p1235_p5 = pnand %p1233_p4, %p1223_p2 }
  0x33   : > { %p1236_p8 = pneg %p1235_p5 }
  0x35   : > { %p1243_p10 = pnand %p1242_p11, %p1236_p8 }
  0x37   : > { %1246 = shalt.err (!%p1243_p10)
}
  0x38   : > { %s1864_s23 = smov 128   ;;  %s1260_s4 = scalar_lea.vmem %s206_s8, 128 }
  0x39   : > { %1053 = dma.hbm_to_vmem [thread:$0]  (!%p1051_p1), %s1850_s1, 2048, %s159_s29, [#allocation10], %s1864_s23, %s1864_s23, %s1367_s19  }
  0x3a   : > { %p1261_p0 = scmp.ne.s32.totalorder %s206_s8, %s1260_s4  ;;  %p1865_p3 = pneg %p1456_p6 }
  0x3b   : > { %s1369_s7 = smov [#allocation11]  }
  0x3c   : > { %p1263_p9 = pnand %p1261_p0, %p1865_p3  ;;  %s1265_s9 = sshll.u32 %s1369_s7, 4  ;;  %s1266_s9 = int_to_ptr.vmem [resolvable:$false] %s1265_s9 }
  0x3d   : > { %s1267_s11 = scalar_lea.vmem %s1266_s9, 256  ;;  %p1268_p7 = scmp.lt.s32.totalorder %s206_s8, %s1266_s9 }
  0x3e   : > { %p1264_p2 = pneg %p1263_p9  ;;  %p1269_p10 = scmp.lt.s32.totalorder %s1267_s11, %s1260_s4 }
  0x40   : > { %p1270_p11 = por %p1269_p10, %p1268_p7 }
  0x42   : > { %p1271_p4 = pnand %p1270_p11, %p1264_p2 }
  0x44   : > { %1274 = shalt.err (!%p1271_p4)
}
  0x45   : > { %1060 = dma.hbm_to_vmem [thread:$0]  (!%p1456_p6), %s203_s21, 128, %s206_s8, %s1460_s6  }
  0x46   : > { %214 = sbr.rel (%p1500_p13) target bundleno = 1108 (0x454), region = 32  ;;  %s216_s19 = sand.u32 (!%p1500_p13), 1, %s1474_s20  }
  0x47   : > { %s1530_s29 = sand.u32 (!%p1500_p13), 1, %s1347_s13   ;;  %s217_s23 = scalar_lea.sflag (!%p1500_p13), [#allocation7], %s216_s19 }
  0x48   : > { %s938_s10 = sshll.u32 (!%p1500_p13), %s1530_s29, 5  ;;  %p1866_p3 = scmp.ne.s32.totalorder (!%p1500_p13), %s1860_s22, 0 }
  0x49   : > { %s1535_s28 = scalar_lea.vmem (!%p1500_p13), [#allocation6], %s938_s10 }
  0x4b   : > { %1326 = dma.done.wait (%p1866_p3), %s217_s23, 512  }
  0x4c   : > { %1328 = vsyncadd (%p1866_p3), %s217_s23, 4294966784  ;;  %p1867_p6 = scmp.eq.s32.totalorder %s1474_s20, 0 }
  0x4e   : > { %1330 = dma.done.wait (%p1867_p6), [#allocation10], 2048   ;;  %p1868_p9 = pmov %p1867_p6 }
  0x4f   : > { %s940_s5 = sshll.u32 %s1530_s29, 3 }
  0x50   : > { %1332 = vsyncadd (%p1868_p9), [#allocation10], 4294965248  ;;  %s1546_s6 = scalar_lea.vmem [#allocation11], %s940_s5 }
  0x51   : > { %1334 = dma.done.wait (%p1866_p3), %s217_s23, 128  }
  0x52   : > { %1336 = vsyncadd (%p1866_p3), %s217_s23, 4294967168  ;;  %v1552_v0 = vld [vmem:[#allocation9 + $0x70] sm:$0xff]  ;;  %v1554_v1 = vld [vmem:[#allocation9 + $0x78] sm:$0xff]  ;;  %vm271_vm0 = vcmask 7168   ;;  %s260_s20 = scalar_lea.vmem [#allocation12], %s938_s10  ;;  %s968_s27 = sshll.u32 %s1355_s15, 9 }
  0x53   : > { %v1556_v2 = vld [vmem:[#allocation9 + $0x60] sm:$0xff]  ;;  %v362_v3 = vmul.f32 %v1552_v0, %v1552_v0  ;;  %v1562_v5 = vld [vmem:[#allocation9 + $0x68] sm:$0xff]  ;;  %v363_v6 = vmul.f32 %v1554_v1, %v1554_v1  ;;  %v1568_v8 = vld [vmem:[#allocation9 + $0x58] sm:$0xff]  ;;  %s813_s22 = sshll.u32 %s260_s20, 4  ;;  %s1802_s30 = scalar_lea.hbm %s1852_s3, %s968_s27  ;;  %s1797_s22 = int_to_ptr.vmem [resolvable:$true] %s813_s22 }
  0x54   : > { %v360_v4 = vmul.f32 %v1556_v2, %v1556_v2  ;;  %v361_v7 = vmul.f32 %v1562_v5, %v1562_v5  ;;  %v1570_v9 = vld [vmem:[#allocation9 + $0x50] sm:$0xff]  ;;  %v359_v10 = vmul.f32 %v1568_v8, %v1568_v8  ;;  %v1576_v12 = vld [vmem:[#allocation9 + $0x48] sm:$0xff]  ;;  %v1578_v13 = vld [vmem:[#allocation9 + $0x40] sm:$0xff]  ;;  %s800_s4 = scalar_lea.sflag [#allocation8], %s1530_s29  ;;  %s1275_s7 = scalar_lea.vmem %s1797_s22, 512 }
  0x55   : > { %392 = vadd.xlane.f32.xlu0 %v362_v3  ;;  %v358_v11 = vmul.f32 %v1570_v9, %v1570_v9  ;;  %v357_v14 = vmul.f32 %v1576_v12, %v1576_v12  ;;  %v356_v15 = vmul.f32 %v1578_v13, %v1578_v13  ;;  %v1584_v16 = vld [vmem:[#allocation9 + $0x38] sm:$0xff]  ;;  %v1586_v17 = vld [vmem:[#allocation9 + $0x30] sm:$0xff]  ;;  %v1592_v20 = vld [vmem:[#allocation9 + $0x28] sm:$0xff]  ;;  %p1276_p13 = scmp.ne.s32.totalorder %s1797_s22, %s1275_s7  ;;  %p1877_p1 = scmp.ne.s32.totalorder %s1861_s25, 0 }
  0x56   : > { %388 = vadd.xlane.f32.xlu1 %v360_v4  ;;  %v355_v18 = vmul.f32 %v1584_v16, %v1584_v16  ;;  %v354_v19 = vmul.f32 %v1586_v17, %v1586_v17  ;;  %v1594_v21 = vld [vmem:[#allocation9 + $0x20] sm:$0xff]  ;;  %v353_v22 = vmul.f32 %v1592_v20, %v1592_v20  ;;  %v1600_v24 = vld [vmem:[#allocation9 + $0x18] sm:$0xff]  ;;  %v1602_v25 = vld [vmem:[#allocation9 + $0x10] sm:$0xff]  ;;  %s1373_s15 = smov [#allocation12]  }
  0x57   : > { %v352_v23 = vmul.f32 %v1594_v21, %v1594_v21  ;;  %v351_v26 = vmul.f32 %v1600_v24, %v1600_v24  ;;  %v350_v27 = vmul.f32 %v1602_v25, %v1602_v25  ;;  %v1609_v28 = vld [vmem:[%s1535_s28 + $0x8] sm:$0xff]  ;;  %v1612_v29 = vld [vmem:[%s1535_s28] sm:$0xff]  ;;  %v1619_v32 = vld [vmem:[%s1535_s28 + $0x18] sm:$0xff]  ;;  %p1277_p5 = pnand %p1276_p13, %p1877_p1  ;;  %s1279_s9 = sshll.u32 %s1373_s15, 4  ;;  %s1280_s9 = int_to_ptr.vmem [resolvable:$false] %s1279_s9 }
  0x58   : > { %v289_v30 = vmul.f32 %v1609_v28, %v1609_v28  ;;  %v288_v31 = vmul.f32 %v1612_v29, %v1612_v29  ;;  %v1622_v33 = vld [vmem:[%s1535_s28 + $0x10] sm:$0xff]  ;;  %v291_v34 = vmul.f32 %v1619_v32, %v1619_v32  ;;  %v1628_v36 = vld [vmem:[#allocation9 + $0x8] sm:$0xff]  ;;  %v1630_v37 = vld [vmem:[#allocation9] sm:$0xff]  ;;  %s1281_s11 = scalar_lea.vmem %s1280_s9, 1024  ;;  %p1282_p12 = scmp.lt.s32.totalorder %s1797_s22, %s1280_s9 }
  0x59   : > { %394 = vadd.xlane.f32.xlu0 %v363_v6  ;;  %v290_v35 = vmul.f32 %v1622_v33, %v1622_v33  ;;  %v349_v38 = vmul.f32 %v1628_v36, %v1628_v36  ;;  %v348_v39 = vmul.f32 %v1630_v37, %v1630_v37  ;;  %p1278_p8 = pneg %p1277_p5  ;;  %p1283_p0 = scmp.lt.s32.totalorder %s1281_s11, %s1275_s7 }
  0x5a   : > { %390 = vadd.xlane.f32.xlu1 %v361_v7 }
  0x5b   : > { %p1284_p2 = por %p1283_p0, %p1282_p12 }
  0x5d   : > { %384 = vadd.xlane.f32.xlu0 %v358_v11  ;;  %p1285_p7 = pnand %p1284_p2, %p1278_p8 }
  0x5e   : > { %386 = vadd.xlane.f32.xlu1 %v359_v10 }
  0x61   : > { %380 = vadd.xlane.f32.xlu0 %v356_v15 }
  0x62   : > { %382 = vadd.xlane.f32.xlu1 %v357_v14 }
  0x65   : > { %376 = vadd.xlane.f32.xlu0 %v354_v19 }
  0x66   : > { %378 = vadd.xlane.f32.xlu1 %v355_v18 }
  0x69   : > { %372 = vadd.xlane.f32.xlu0 %v352_v23 }
  0x6a   : > { %374 = vadd.xlane.f32.xlu1 %v353_v22 }
  0x6d   : > { %368 = vadd.xlane.f32.xlu0 %v350_v27 }
  0x6e   : > { %370 = vadd.xlane.f32.xlu1 %v351_v26 }
  0x71   : > { %292 = vadd.xlane.f32.xlu0 %v288_v31 }
  0x72   : > { %294 = vadd.xlane.f32.xlu1 %v289_v30 }
  0x75   : > { %296 = vadd.xlane.f32.xlu0 %v290_v35 }
  0x76   : > { %298 = vadd.xlane.f32.xlu1 %v291_v34 }
  0x79   : > { %364 = vadd.xlane.f32.xlu0 %v348_v39 }
  0x7a   : > { %366 = vadd.xlane.f32.xlu1 %v349_v38 }
  0xde   : > { %v393_v40 = vpop.xlane.xlu0 %392 }
  0xdf   : > { %v389_v41 = vpop.xlane.xlu1 %388  ;;  %v410_v42 = vmax.f32 %v393_v40, 1e-24 }
  0xe0   : > { %v408_v43 = vmax.f32 %v389_v41, 1e-24 }
  0xe2   : > { %v395_v44 = vpop.xlane.xlu0 %394  ;;  %1129 = vrsqrt.f32 %v408_v43 }
  0xe3   : > { %v391_v45 = vpop.xlane.xlu1 %390  ;;  %1131 = vrsqrt.f32 %v410_v42  ;;  %v411_v46 = vmax.f32 %v395_v44, 1e-24 }
  0xe4   : > { %v409_v47 = vmax.f32 %v391_v45, 1e-24 }
  0xe5   : > { %1133 = vrsqrt.f32 %v411_v46 }
  0xe6   : > { %1135 = vrsqrt.f32 %v409_v47  ;;  %v385_v49 = vpop.xlane.xlu0 %384 }
  0xe7   : > { %v387_v48 = vpop.xlane.xlu1 %386  ;;  %v406_v51 = vmax.f32 %v385_v49, 1e-24 }
  0xe8   : > { %v407_v50 = vmax.f32 %v387_v48, 1e-24 }
  0xea   : > { %1137 = vrsqrt.f32 %v407_v50  ;;  %v381_v53 = vpop.xlane.xlu0 %380 }
  0xeb   : > { %1139 = vrsqrt.f32 %v406_v51  ;;  %v383_v52 = vpop.xlane.xlu1 %382  ;;  %v404_v55 = vmax.f32 %v381_v53, 1e-24 }
  0xec   : > { %v405_v54 = vmax.f32 %v383_v52, 1e-24 }
  0xee   : > { %v377_v57 = vpop.xlane.xlu0 %376  ;;  %1141 = vrsqrt.f32 %v405_v54 }
  0xef   : > { %v379_v56 = vpop.xlane.xlu1 %378  ;;  %v1130_v58 = vpop.eup %1129  ;;  %1143 = vrsqrt.f32 %v404_v55  ;;  %v402_v14 = vmax.f32 %v377_v57, 1e-24 }
  0xf0   : > { %v1132_v59 = vpop.eup %1131  ;;  %v440_v61 = vmul.f32 %v1130_v58, %v1556_v2  ;;  %v403_v10 = vmax.f32 %v379_v56, 1e-24 }
  0xf1   : > { %v442_v4 = vmul.f32 %v1132_v59, %v1552_v0 }
  0xf2   : > { %v1134_v60 = vpop.eup %1133  ;;  %v373_v63 = vpop.xlane.xlu0 %372  ;;  %1145 = vrsqrt.f32 %v403_v10 }
  0xf3   : > { %v375_v62 = vpop.xlane.xlu1 %374  ;;  %v1136_v3 = vpop.eup %1135  ;;  %v443_v6 = vmul.f32 %v1134_v60, %v1554_v1  ;;  %1147 = vrsqrt.f32 %v402_v14  ;;  %v400_v39 = vmax.f32 %v373_v63, 1e-24 }
  0xf4   : > { %v441_v7 = vmul.f32 %v1136_v3, %v1562_v5  ;;  %v401_v34 = vmax.f32 %v375_v62, 1e-24 }
  0xf5   : > { %v451_v11 = vpack.c.bf16 %v443_v6, %v442_v4 }
  0xf6   : > { %v450_v18 = vpack.c.bf16 %v441_v7, %v440_v61  ;;  %v369_v22 = vpop.xlane.xlu0 %368 }
  0xf7   : > { %v1138_v15 = vpop.eup %1137  ;;  %v371_v19 = vpop.xlane.xlu1 %370  ;;  %1000 = vmatprep.subr.bf16.mxu0 %v451_v11  ;;  %v398_v51 = vmax.f32 %v369_v22, 1e-24 }
  0xf8   : > { %v1140_v23 = vpop.eup %1139  ;;  %1001 = vmatpush3.bf16.xpose.msra.mxu0 %v451_v11  ;;  %v439_v27 = vmul.f32 %v1138_v15, %v1568_v8  ;;  %v399_v49 = vmax.f32 %v371_v19, 1e-24 }
  0xf9   : > { %1002 = vmatprep.subr.bf16.mxu0 %v450_v18  ;;  %v438_v26 = vmul.f32 %v1140_v23, %v1570_v9 }
  0xfa   : > { %v293_v31 = vpop.xlane.xlu0 %292 }
  0xfb   : > { %v295_v30 = vpop.xlane.xlu1 %294  ;;  %v300_v38 = vmax.f32 %v293_v31, 1e-24  ;;  %v1142_v40 = vpop.eup %1141  ;;  %v449_v41 = vpack.c.bf16 %v439_v27, %v438_v26 }
  0xfc   : > { %v301_v35 = vmax.f32 %v295_v30, 1e-24  ;;  %v1144_v42 = vpop.eup %1143  ;;  %v437_v48 = vmul.f32 %v1142_v40, %v1576_v12 }
  0xfd   : > { %v436_v47 = vmul.f32 %v1144_v42, %v1578_v13 }
  0xfe   : > { %1149 = vrsqrt.f32 %v301_v35  ;;  %v297_v44 = vpop.xlane.xlu0 %296 }
  0xff   : > { %1151 = vrsqrt.f32 %v300_v38  ;;  %v299_v43 = vpop.xlane.xlu1 %298  ;;  %v302_v46 = vmax.f32 %v297_v44, 1e-24  ;;  %v1146_v50 = vpop.eup %1145  ;;  %v448_v52 = vpack.c.bf16 %v437_v48, %v436_v47  ;;  %v1370_v44 = vmov 0  }
 0x100   : > { %1153 = vrsqrt.f32 %v401_v34  ;;  %v303_v45 = vmax.f32 %v299_v43, 1e-24  ;;  %1003 = vmatpush3.bf16.xpose.msra.mxu0 %v450_v18  ;;  %v1148_v53 = vpop.eup %1147  ;;  %v435_v55 = vmul.f32 %v1146_v50, %v1584_v16  ;;  %1125 = vset.pattern.permute.xlu0 %v1370_v44 }
 0x101   : > { %1155 = vrsqrt.f32 %v400_v39  ;;  %1004 = vmatprep.subr.bf16.mxu0 %v449_v41  ;;  %v434_v54 = vmul.f32 %v1148_v53, %v1586_v17  ;;  %1126 = vset.pattern.permute.xlu1 %v1370_v44 }
 0x102   : > { %1157 = vrsqrt.f32 %v303_v45  ;;  %v365_v58 = vpop.xlane.xlu0 %364  ;;  %v1371_v45 = vmov -1e+30  }
 0x103   : > { %1159 = vrsqrt.f32 %v302_v46  ;;  %v367_v56 = vpop.xlane.xlu1 %366  ;;  %v447_v4 = vpack.c.bf16 %v435_v55, %v434_v54  ;;  %v396_v6 = vmax.f32 %v365_v58, 1e-24  ;;  %272 = vst.msk [vmem:[#allocation2] sm:$0xff] %vm271_vm0, %v1371_v45  ;;  %273 = vst.msk [vmem:[#allocation2 + $0x8] sm:$0xff] %vm271_vm0, %v1371_v45  ;;  %v525_v46 = vld [vmem:[%s1546_s6] sm:$0xff] }
 0x104   : > { %1161 = vrsqrt.f32 %v399_v49  ;;  %v397_v63 = vmax.f32 %v367_v56, 1e-24  ;;  %274 = vst.msk [vmem:[#allocation2 + $0x10] sm:$0xff] %vm271_vm0, %v1371_v45  ;;  %275 = vst.msk [vmem:[#allocation2 + $0x18] sm:$0xff] %vm271_vm0, %v1371_v45  ;;  %vm526_vm1 = vnez %v525_v46 }
 0x105   : > { %1163 = vrsqrt.f32 %v398_v51  ;;  %v527_v47 = vsel %vm526_vm1, 16843009, %v1370_v44 }
 0x106   : > { %1165 = vrsqrt.f32 %v397_v63  ;;  %v528_v48 = vunpack.c.0.s8 %v527_v47  ;;  %v530_v50 = vunpack.c.2.s8 %v527_v47  ;;  %v529_v51 = vunpack.c.1.s8 %v527_v47 }
 0x107   : > { %1167 = vrsqrt.f32 %v396_v6  ;;  %v531_v55 = vunpack.c.3.s8 %v527_v47 }
 0x108   : > { %1005 = vmatpush3.bf16.xpose.msra.mxu0 %v449_v41  ;;  %v532_v49 = vpack.c.b16 %v528_v48, %v528_v48  ;;  %v536_v53 = vpack.c.b16 %v530_v50, %v530_v50  ;;  %v534_v54 = vpack.c.b16 %v529_v51, %v529_v51  ;;  %v455_v51 = vpack.c.bf16 %v1584_v16, %v1586_v17 }
 0x109   : > { %1006 = vmatprep.subr.bf16.mxu0 %v448_v52  ;;  %v538_v58 = vpack.c.b16 %v531_v55, %v531_v55 }
 0x10a   : > { %v537_v56 = vpack.c.b8 %v536_v53, %v536_v53 }
 0x10b   : > { %v1150_v57 = vpop.eup %1149  ;;  %v1725_v47 = vld [vmem:[#allocation2 + $0x18] sm:$0xff] }
 0x10c   : > { %v1152_v59 = vpop.eup %1151  ;;  %v309_v60 = vmul.f32 %v1150_v57, %v1609_v28  ;;  %v535_v57 = vpack.c.b8 %v534_v54, %v534_v54  ;;  %vm542_vm3 = vnez %v537_v56 }
 0x10d   : > { %v1154_v61 = vpop.eup %1153  ;;  %v308_v62 = vmul.f32 %v1152_v59, %v1612_v29 }
 0x10e   : > { %v1156_v3 = vpop.eup %1155  ;;  %v433_v19 = vmul.f32 %v1154_v61, %v1592_v20  ;;  %vm541_vm4 = vnez %v535_v57 }
 0x10f   : > { %v1158_v7 = vpop.eup %1157  ;;  %v972_v10 = vpack.c.bf16 %v309_v60, %v308_v62  ;;  %v432_v18 = vmul.f32 %v1156_v3, %v1594_v21  ;;  %v539_v60 = vpack.c.b8 %v538_v58, %v538_v58  ;;  %v546_v62 = vsel %vm542_vm3, 16843009, %v1370_v44 }
 0x110   : > { %v1160_v11 = vpop.eup %1159  ;;  %v311_v14 = vmul.f32 %v1158_v7, %v1619_v32  ;;  %1007 = vmatpush3.bf16.xpose.msra.mxu0 %v448_v52  ;;  %v533_v52 = vpack.c.b8 %v532_v49, %v532_v49  ;;  %v545_v63 = vsel %vm541_vm4, 16843009, %v1370_v44  ;;  %v550_v6 = vunpack.c.0.s8 %v546_v62 }
 0x111   : > { %973 = vst [vmem:[#allocation5] sm:$0xff] %v972_v10   ;;  %v310_v15 = vmul.f32 %v1160_v11, %v1622_v33  ;;  %1008 = vmatprep.subr.bf16.mxu0 %v447_v4  ;;  %v1162_v23 = vpop.eup %1161  ;;  %v446_v26 = vpack.c.bf16 %v433_v19, %v432_v18  ;;  %vm543_vm5 = vnez %v539_v60  ;;  %v549_v7 = vunpack.c.0.s8 %v545_v63 }
 0x112   : > { %v1164_v27 = vpop.eup %1163  ;;  %v431_v34 = vmul.f32 %v1162_v23, %v1600_v24  ;;  %vm540_vm2 = vnez %v533_v52  ;;  %v547_v10 = vsel %vm543_vm5, 16843009, %v1370_v44  ;;  %vm1670_vm7 = vcmp.ne.s32.totalorder %v550_v6, 0 }
 0x113   : > { %v977_v22 = vpack.c.bf16 %v311_v14, %v310_v15  ;;  %v430_v31 = vmul.f32 %v1164_v27, %v1602_v25  ;;  %v1166_v35 = vpop.eup %1165  ;;  %v544_v59 = vsel %vm540_vm2, 16843009, %v1370_v44  ;;  %vm1674_vm8 = vcmp.ne.s32.totalorder %v549_v7, 0  ;;  %vm954_vm14 = vmneg %vm1670_vm7 }
 0x114   : > { %v1168_v39 = vpop.eup %1167  ;;  %v429_v41 = vmul.f32 %v1166_v35, %v1628_v36  ;;  %v548_v61 = vunpack.c.0.s8 %v544_v59  ;;  %v1701_v35 = vld [vmem:[#allocation2] sm:$0xff]  ;;  %v452_v52 = vpack.c.bf16 %v1628_v36, %v1630_v37  ;;  %vm948_vm10 = vmneg %vm1674_vm8 }
 0x115   : > { %979 = vst [vmem:[#allocation5 + $0x8] sm:$0xff] %v977_v22   ;;  %v445_v38 = vpack.c.bf16 %v431_v34, %v430_v31  ;;  %v428_v40 = vmul.f32 %v1168_v39, %v1630_v37  ;;  %v551_v22 = vunpack.c.0.s8 %v547_v10  ;;  %v1372_v34 = vmov 0.0  }
 0x116   : > { %vm1661_vm6 = vcmp.ne.s32.totalorder %v548_v61, 0  ;;  %276 = vst.msk [vmem:[#allocation3] sm:$0xff] %vm271_vm0, %v1372_v34  ;;  %277 = vst.msk [vmem:[#allocation3 + $0x8] sm:$0xff] %vm271_vm0, %v1372_v34 }
 0x117   : > { %v444_v42 = vpack.c.bf16 %v429_v41, %v428_v40  ;;  %vm1688_vm9 = vcmp.ne.s32.totalorder %v551_v22, 0  ;;  %278 = vst.msk [vmem:[#allocation3 + $0x10] sm:$0xff] %vm271_vm0, %v1372_v34  ;;  %279 = vst.msk [vmem:[#allocation3 + $0x18] sm:$0xff] %vm271_vm0, %v1372_v34  ;;  %v1708_v41 = vld [vmem:[#allocation2 + $0x10] sm:$0xff] }
 0x118   : > { %v1127_v30 = vld [vmem:[#allocation5] sm:$0xff]   ;;  %1009 = vmatpush3.bf16.xpose.msra.mxu0 %v447_v4  ;;  %vm949_vm11 = vmneg %vm1661_vm6 }
 0x119   : > { %1010 = vmatprep.subr.bf16.mxu0 %v446_v26  ;;  %1016 = vmatprep.mubr.bf16.mxu0 %v1127_v30  ;;  %vm950_vm12 = vmpackc.low %vm948_vm10, %vm949_vm11 }
 0x11a   : > { %vm953_vm13 = vmneg %vm1688_vm9 }
 0x11b   : > { %vm955_vm15 = vmpackc.low %vm953_vm13, %vm954_vm14 }
 0x11c   : > { %v1128_v43 = vld [vmem:[#allocation5 + $0x8] sm:$0xff]  }
 0x11e   : > { %v626_v30 = vld [vmem:[#allocation3 + $0x10] sm:$0xff] }
 0x120   : > { %1011 = vmatpush3.bf16.xpose.msra.mxu0 %v446_v26 }
 0x121   : > { %1012 = vmatprep.subr.bf16.mxu0 %v445_v38 }
 0x128   : > { %1013 = vmatpush3.bf16.xpose.msra.mxu0 %v445_v38  ;;  %v459_v38 = vpack.c.bf16 %v1554_v1, %v1552_v0 }
 0x129   : > { %1014 = vmatprep.subr.bf16.mxu0 %v444_v42 }
 0x12a   : > { %1020 = vmatprep.subr.bf16.mxu1 %v459_v38 }
 0x12b   : > { %1021 = vmatpush3.bf16.msra.mxu1 %v459_v38  ;;  %v625_v38 = vld [vmem:[#allocation3 + $0x8] sm:$0xff] }
 0x130   : > { %1015 = vmatpush3.bf16.xpose.msra.mxu0 %v444_v42  ;;  %v1710_v42 = vld [vmem:[#allocation2 + $0x8] sm:$0xff] }
 0x137   : > { %1017 = vmatmul.mubr.bf16.vlgmr.msra.gmra.mxu0 %v1128_v43  ;;  %v458_v43 = vpack.c.bf16 %v1562_v5, %v1556_v2  ;;  %v457_v2 = vpack.c.bf16 %v1568_v8, %v1570_v9  ;;  %v456_v8 = vpack.c.bf16 %v1576_v12, %v1578_v13  ;;  %v454_v12 = vpack.c.bf16 %v1592_v20, %v1594_v21 }
 0x138   : > { %v453_v13 = vpack.c.bf16 %v1600_v24, %v1602_v25 }
 0x139   : > { %1022 = vmatprep.subr.bf16.mxu1 %v458_v43 }
 0x13a   : > { %1023 = vmatpush3.bf16.msra.mxu1 %v458_v43 }
 0x13b   : > { %1024 = vmatprep.subr.bf16.mxu1 %v457_v2 }
 0x13e   : > { %1025 = vmatpush3.bf16.msra.mxu1 %v457_v2 }
 0x13f   : > { %1026 = vmatprep.subr.bf16.mxu1 %v456_v8 }
 0x142   : > { %1027 = vmatpush3.bf16.msra.mxu1 %v456_v8 }
 0x143   : > { %1028 = vmatprep.subr.bf16.mxu1 %v455_v51 }
 0x146   : > { %1029 = vmatpush3.bf16.msra.mxu1 %v455_v51 }
 0x147   : > { %1030 = vmatprep.subr.bf16.mxu1 %v454_v12 }
 0x14a   : > { %1031 = vmatpush3.bf16.msra.mxu1 %v454_v12 }
 0x14b   : > { %1032 = vmatprep.subr.bf16.mxu1 %v453_v13 }
 0x14e   : > { %1033 = vmatpush3.bf16.msra.mxu1 %v453_v13 }
 0x14f   : > { %1034 = vmatprep.subr.bf16.mxu1 %v452_v52 }
 0x152   : > { %1035 = vmatpush3.bf16.msra.mxu1 %v452_v52 }
 0x1f7   : > { %v1018_v3 = vpop.f32.mrf.mxu0 }
 0x1f8   : > { %v1680_v26 = vsel %vm1670_vm7, -1e+30, %v1018_v3 }
 0x1f9   : > { %v510_v11 = vpop.f32.mrf.mxu0 }
 0x1fa   : > { %v1667_v14 = vsel %vm1661_vm6, -1e+30, %v510_v11 }
 0x1fb   : > { %564 = vmax.xlane.f32.xlu0 %v1667_v14  ;;  %v1019_v15 = vpop.f32.mrf.mxu0 }
 0x1fc   : > { %v1694_v31 = vsel %vm1688_vm9, -1e+30, %v1019_v15 }
 0x1fd   : > { %v513_v23 = vpop.f32.mrf.mxu0 }
 0x1fe   : > { %v1684_v27 = vsel %vm1674_vm8, -1e+30, %v513_v23  ;;  %v624_v23 = vld [vmem:[#allocation3] sm:$0xff] }
 0x1ff   : > { %568 = vmax.xlane.f32.xlu0 %v1680_v26  ;;  %566 = vmax.xlane.f32.xlu1 %v1684_v27 }
 0x203   : > { %570 = vmax.xlane.f32.xlu1 %v1694_v31 }
 0x284   : > { %v565_v39 = vpop.xlane.xlu0 %564 }
 0x285   : > { %v1706_v40 = vmax.f32 %v1701_v35, %v565_v39 }
 0x287   : > { %v576_v44 = vsub.f32 %v1701_v35, %v1706_v40  ;;  %736 = vst.msk [vmem:[#allocation2] sm:$0xff] %vm271_vm0, %v1706_v40  ;;  %590 = vperm.xlu0 %1125, %v1706_v40  }
 0x288   : > { %v569_v0 = vpop.xlane.xlu0 %568  ;;  %v567_v1 = vpop.xlane.xlu1 %566 }
 0x289   : > { %v1720_v45 = vmax.f32 %v1708_v41, %v569_v0  ;;  %v1723_v46 = vmax.f32 %v1710_v42, %v567_v1  ;;  %v580_v4 = vmul.f32 1.442695, %v576_v44 }
 0x28b   : > { %v578_v5 = vsub.f32 %v1708_v41, %v1720_v45  ;;  %738 = vst.msk [vmem:[#allocation2 + $0x10] sm:$0xff] %vm271_vm0, %v1720_v45  ;;  %v577_v48 = vsub.f32 %v1710_v42, %v1723_v46  ;;  %737 = vst.msk [vmem:[#allocation2 + $0x8] sm:$0xff] %vm271_vm0, %v1723_v46  ;;  %600 = vperm.xlu1 %1126, %v1720_v45   ;;  %v627_v42 = vld [vmem:[#allocation3 + $0x18] sm:$0xff] }
 0x28c   : > { %v571_v49 = vpop.xlane.xlu1 %570 }
 0x28d   : > { %v1739_v50 = vmax.f32 %v1725_v47, %v571_v49  ;;  %v582_v10 = vmul.f32 1.442695, %v577_v48  ;;  %v584_v11 = vmul.f32 1.442695, %v578_v5 }
 0x28f   : > { %v579_v9 = vsub.f32 %v1725_v47, %v1739_v50  ;;  %739 = vst.msk [vmem:[#allocation2 + $0x18] sm:$0xff] %vm271_vm0, %v1739_v50  ;;  %595 = vperm.xlu1 %1126, %v1723_v46  }
 0x293   : > { %605 = vperm.xlu1 %1126, %v1739_v50  }
 0x302   : > { %v591_v16 = vpop.permute.xlu0 %590 }
 0x303   : > { %v608_v17 = vsub.f32 %v1667_v14, %v591_v16  ;;  %v586_v14 = vmul.f32 1.442695, %v579_v9 }
 0x305   : > { %v612_v53 = vmul.f32 1.442695, %v608_v17 }
 0x306   : > { %v601_v54 = vpop.permute.xlu1 %600 }
 0x307   : > { %1169 = vpow2.f32 %v612_v53  ;;  %v610_v20 = vsub.f32 %v1680_v26, %v601_v54 }
 0x309   : > { %v616_v21 = vmul.f32 1.442695, %v610_v20  ;;  %v783_v20 = vmul.f32 1.1, %v1612_v29 }
 0x30a   : > { %v596_v55 = vpop.permute.xlu1 %595 }
 0x30b   : > { %1171 = vpow2.f32 %v616_v21  ;;  %v609_v24 = vsub.f32 %v1684_v27, %v596_v55 }
 0x30d   : > { %v614_v25 = vmul.f32 1.442695, %v609_v24 }
 0x30e   : > { %v606_v56 = vpop.permute.xlu1 %605 }
 0x30f   : > { %1173 = vpow2.f32 %v614_v25  ;;  %v611_v36 = vsub.f32 %v1694_v31, %v606_v56 }
 0x311   : > { %v618_v37 = vmul.f32 1.442695, %v611_v36 }
 0x313   : > { %1175 = vpow2.f32 %v618_v37 }
 0x314   : > { %v1170_v57 = vpop.eup %1169  ;;  %1177 = vpow2.f32 %v580_v4 }
 0x315   : > { %v620_v58 = vsel %vm1661_vm6, 0.0, %v1170_v57  ;;  %1179 = vpow2.f32 %v582_v10 }
 0x316   : > { %632 = vadd.xlane.f32.xlu1 %v620_v58  ;;  %1181 = vpow2.f32 %v584_v11  ;;  %v785_v58 = vmul.f32 1.1, %v1622_v33  ;;  %v786_v11 = vmul.f32 1.1, %v1619_v32 }
 0x317   : > { %1183 = vpow2.f32 %v586_v14 }
 0x318   : > { %v1172_v59 = vpop.eup %1171 }
 0x319   : > { %v622_v60 = vsel %vm1670_vm7, 0.0, %v1172_v59 }
 0x31a   : > { %636 = vadd.xlane.f32.xlu1 %v622_v60 }
 0x31c   : > { %v1174_v61 = vpop.eup %1173 }
 0x31d   : > { %v621_v62 = vsel %vm1674_vm8, 0.0, %v1174_v61  ;;  %v951_v63 = vpack.c.bf16 %v1174_v61, %v1170_v57 }
 0x31e   : > { %634 = vadd.xlane.f32.xlu0 %v621_v62 }
 0x31f   : > { %1036 = vmatprep.mubr.msk.bf16.mxu1 %vm950_vm12, %v951_v63 }
 0x320   : > { %v1176_v3 = vpop.eup %1175 }
 0x321   : > { %v623_v6 = vsel %vm1688_vm9, 0.0, %v1176_v3  ;;  %v956_v7 = vpack.c.bf16 %v1176_v3, %v1172_v59  ;;  %v1178_v15 = vpop.eup %1177  ;;  %v784_v3 = vmul.f32 1.1, %v1609_v28 }
 0x322   : > { %638 = vadd.xlane.f32.xlu1 %v623_v6  ;;  %v1180_v18 = vpop.eup %1179  ;;  %v628_v26 = vmul.f32 %v1178_v15, %v624_v23 }
 0x323   : > { %1037 = vmatmul.mubr.msk.bf16.vlgmr.msra.gmra.mxu1 %vm955_vm15, %v956_v7  ;;  %v1182_v19 = vpop.eup %1181  ;;  %v629_v40 = vmul.f32 %v1180_v18, %v625_v38 }
 0x324   : > { %v1184_v22 = vpop.eup %1183  ;;  %v630_v34 = vmul.f32 %v1182_v19, %v626_v30 }
 0x325   : > { %v631_v0 = vmul.f32 %v1184_v22, %v627_v42 }
 0x333   : > { %655 = vperm.xlu1 %1126, %v1178_v15  }
 0x334   : > { %660 = vperm.xlu0 %1125, %v1180_v18  }
 0x337   : > { %665 = vperm.xlu1 %1126, %v1182_v19  }
 0x33b   : > { %670 = vperm.xlu1 %1126, %v1184_v22  }
 0x39f   : > { %v633_v27 = vpop.xlane.xlu1 %632 }
 0x3a0   : > { %v640_v31 = vadd.f32 %v633_v27, %v628_v26 }
 0x3a2   : > { %645 = vst.msk [vmem:[#allocation3] sm:$0xff] %vm271_vm0, %v640_v31 }
 0x3a3   : > { %v637_v35 = vpop.xlane.xlu1 %636 }
 0x3a4   : > { %v642_v39 = vadd.f32 %v637_v35, %v630_v34 }
 0x3a6   : > { %647 = vst.msk [vmem:[#allocation3 + $0x10] sm:$0xff] %vm271_vm0, %v642_v39 }
 0x3a7   : > { %v635_v41 = vpop.xlane.xlu0 %634 }
 0x3a8   : > { %v641_v43 = vadd.f32 %v635_v41, %v629_v40 }
 0x3a9   : > { %v747_v44 = vld [vmem:[#allocation3] sm:$0xff] }
 0x3aa   : > { %646 = vst.msk [vmem:[#allocation3 + $0x8] sm:$0xff] %vm271_vm0, %v641_v43  ;;  %1185 = vrcp.f32 %v747_v44 }
 0x3ab   : > { %v639_v1 = vpop.xlane.xlu1 %638 }
 0x3ac   : > { %v643_v45 = vadd.f32 %v639_v1, %v631_v0 }
 0x3ad   : > { %v749_v46 = vld [vmem:[#allocation3 + $0x10] sm:$0xff] }
 0x3ae   : > { %648 = vst.msk [vmem:[#allocation3 + $0x18] sm:$0xff] %vm271_vm0, %v643_v45  ;;  %1187 = vrcp.f32 %v749_v46 }
 0x3af   : > { %v656_v8 = vpop.permute.xlu1 %655  ;;  %v661_v55 = vpop.permute.xlu0 %660 }
 0x3b0   : > { %v673_v52 = vmul.f32 0.0, %v656_v8  ;;  %v674_v37 = vmul.f32 0.0, %v661_v55 }
 0x3b1   : > { %v748_v47 = vld [vmem:[#allocation3 + $0x8] sm:$0xff] }
 0x3b2   : > { %1189 = vrcp.f32 %v748_v47 }
 0x3b3   : > { %v666_v9 = vpop.permute.xlu1 %665 }
 0x3b4   : > { %v675_v54 = vmul.f32 0.0, %v666_v9 }
 0x3b5   : > { %v750_v2 = vld [vmem:[#allocation3 + $0x18] sm:$0xff] }
 0x3b6   : > { %1191 = vrcp.f32 %v750_v2 }
 0x3b7   : > { %v1186_v5 = vpop.eup %1185  ;;  %v671_v12 = vpop.permute.xlu1 %670 }
 0x3b8   : > { %757 = vperm.xlu1 %1126, %v1186_v5   ;;  %v676_v63 = vmul.f32 0.0, %v671_v12 }
 0x3bb   : > { %v1188_v48 = vpop.eup %1187 }
 0x3bc   : > { %767 = vperm.xlu1 %1126, %v1188_v48  }
 0x3bf   : > { %v1190_v49 = vpop.eup %1189 }
 0x3c0   : > { %762 = vperm.xlu0 %1125, %v1190_v49  }
 0x3c3   : > { %v1192_v50 = vpop.eup %1191 }
 0x3c4   : > { %772 = vperm.xlu0 %1125, %v1192_v50  }
 0x3e3   : > { %v1038_v51 = vpop.f32.mrf.mxu1 }
 0x3e4   : > { %v730_v24 = vadd.f32 %v1038_v51, %v675_v54 }
 0x3e5   : > { %v713_v13 = vpop.f32.mrf.mxu1 }
 0x3e6   : > { %v728_v16 = vadd.f32 %v713_v13, %v673_v52 }
 0x3e7   : > { %v1039_v17 = vpop.f32.mrf.mxu1 }
 0x3e8   : > { %v731_v6 = vadd.f32 %v1039_v17, %v676_v63 }
 0x3e9   : > { %v716_v56 = vpop.f32.mrf.mxu1 }
 0x3ea   : > { %v729_v60 = vadd.f32 %v716_v56, %v674_v37 }
 0x433   : > { %v758_v53 = vpop.permute.xlu1 %757 }
 0x434   : > { %v775_v21 = vmul.f32 %v758_v53, %v728_v16 }
 0x436   : > { %v787_v25 = vmul.f32 0.1, %v775_v21 }
 0x437   : > { %v768_v36 = vpop.permute.xlu1 %767 }
 0x438   : > { %v791_v57 = vsub.f32 %v783_v20, %v787_v25  ;;  %v777_v59 = vmul.f32 %v768_v36, %v730_v24 }
 0x43a   : > { %795 = vst [vmem:[%s260_s20] sm:$0xff] %v791_v57  ;;  %v789_v61 = vmul.f32 0.1, %v777_v59 }
 0x43b   : > { %v763_v62 = vpop.permute.xlu0 %762 }
 0x43c   : > { %v793_v29 = vsub.f32 %v785_v58, %v789_v61  ;;  %v776_v4 = vmul.f32 %v763_v62, %v729_v60 }
 0x43e   : > { %797 = vst [vmem:[%s260_s20 + $0x10] sm:$0xff] %v793_v29  ;;  %v788_v7 = vmul.f32 0.1, %v776_v4 }
 0x43f   : > { %v773_v33 = vpop.permute.xlu0 %772 }
 0x440   : > { %v792_v10 = vsub.f32 %v784_v3, %v788_v7  ;;  %v778_v14 = vmul.f32 %v773_v33, %v731_v6 }
 0x442   : > { %796 = vst [vmem:[%s260_s20 + $0x8] sm:$0xff] %v792_v10  ;;  %v790_v28 = vmul.f32 0.1, %v778_v14 }
 0x444   : > { %v794_v15 = vsub.f32 %v786_v11, %v790_v28 }
 0x446   : > { %798 = vst [vmem:[%s260_s20 + $0x18] sm:$0xff] %v794_v15 }
 0x447   : > { %1288 = shalt.err (!%p1285_p7)
}
 0x448   : > { %s1289_s19 = scalar_lea.hbm %s1802_s30, 512  ;;  %s1293_s28 = scalar_lea.hbm %s1852_s3, 2048 }
 0x449   : > { %p1290_p10 = scmp.ne.s32.totalorder %s1802_s30, %s1289_s19  ;;  %p1294_p3 = scmp.lt.s32.totalorder %s1802_s30, %s1852_s3 }
 0x44a   : > { %p1295_p6 = scmp.lt.s32.totalorder %s1293_s28, %s1289_s19 }
 0x44b   : > { %p1291_p11 = pnand %p1290_p10, %p1877_p1 }
 0x44c   : > { %p1296_p9 = por %p1295_p6, %p1294_p3 }
 0x44d   : > { %p1292_p4 = pneg %p1291_p11 }
 0x44f   : > { %p1297_p13 = pnand %p1296_p9, %p1292_p4 }
 0x451   : > { %1300 = shalt.err (!%p1297_p13)
}
 0x452   : > { %s1374_s20 = smov 128   ;;  %s1375_s27 = smov 8  }
 0x453   : > { %1048 = dma.vmem_to_hbm [thread:$0]  (%p1877_p1), %s1797_s22, 512, %s1802_s30, %s800_s4, %s1374_s20, %s1374_s20, %s1375_s27  }
 0x454 PF: > { %p1068_p5 = scmp.ge.s32.totalorder %s1363_s17, 2  ;;  %s828_s8 = sand.u32 1, %s1343_s12  }
 0x455   : > { %p1878_p8 = scmp.ne.s32.totalorder %s1862_s26, 0  ;;  %s829_s21 = scalar_lea.sflag [#allocation8], %s828_s8 }
 0x457   : > { %p1062_p12 = pnand %p1068_p5, %p1878_p8 }
 0x459   : > { %p1063_p0 = pneg %p1062_p12 }
 0x45b   : > { %1338 = dma.done.wait (%p1063_p0), %s829_s21, 512  }
 0x45c   : > { %1340 = vsyncadd (%p1063_p0), %s829_s21, 4294966784  ;;  %s20_s17 = sadd.s32 1, %s1363_s17   ;;  %s1879_s12 = smov %s1347_s13 }
 0x45d   : > { %p17_p2 = scmp.ge.s32.totalorder %s20_s17, 6   ;;  %s1880_s13 = smov %s1351_s14 }
 0x45e   : > { %s1881_s14 = smov %s1446_s24  ;;  %s1882_s15 = smov %s1359_s16 }
 0x45f   : > { %s1883_s16 = smov %s1885_s18  ;;  %19 = sbr.rel (!%p17_p2) target bundleno = 7 (0x7), region = 101 }
 0x464   :  { %834 = vsyncpa [#allocation7], 1 }
 0x465   :  { %836 = vsyncpa [#allocation7 + $0x1], 1 }
 0x466   :  { %837 = vsyncpa [#allocation10], 1 }
 0x467   :  { %838 = vsyncpa [#allocation8], 1 }
 0x468   :  { %840 = vsyncpa [#allocation8 + $0x1], 1 }

</bundles_post_ra>
